<compile_context>
chip_gen: v5e
topology: v5e:2x2
jax: 0.10.0
libtpu: 0.0.40
codegen_flags: <defaults>
</compile_context>

<pallas_src>
import functools

import jax
import jax.numpy as jnp
from jax.experimental import pallas as pl
from jax.experimental.pallas import tpu as pltpu

_EPS = 1e-5
_VMEM_LIMIT = 64 * 1024 * 1024


def _round_up(x, m):
    return (x + m - 1) // m * m


# ---------------------------------------------------------------------------
# Pallas kernels
# ---------------------------------------------------------------------------
def _apply_act(x, act):
    if act == "relu":
        return jnp.maximum(x, 0.0)
    if act == "lrelu":
        return jnp.where(x > 0, x, 0.2 * x)
    return x


def _conv_bias_act_kernel(p_ref, w_ref, b_ref, y_ref, *, act):
    """y = act(W @ patches + b); lane axis = spatial tile TP (lane-dense)."""
    acc = jnp.dot(w_ref[...], p_ref[0], preferred_element_type=jnp.float32)
    acc = acc + b_ref[...]
    y_ref[0] = _apply_act(acc, act)


def _conv_in_act_fused_kernel(p_ref, w_ref, b_ref, y_ref, *, tp, p_valid, act):
    """conv + bias + InstanceNorm + act with the whole spatial extent in one tile."""
    acc = jnp.dot(w_ref[...], p_ref[0], preferred_element_type=jnp.float32)
    acc = acc + b_ref[...]                               # (Cout, TP), f32
    inv_n = 1.0 / p_valid
    if p_valid == tp:                                    # no spatial padding
        mean = jnp.sum(acc, axis=1, keepdims=True) * inv_n
        cen = acc - mean
        var = jnp.sum(cen * cen, axis=1, keepdims=True) * inv_n
    else:                                                # mask padded lanes
        mask = jax.lax.broadcasted_iota(jnp.int32, acc.shape, 1) < p_valid
        am = jnp.where(mask, acc, 0.0)
        mean = jnp.sum(am, axis=1, keepdims=True) * inv_n
        cen = jnp.where(mask, acc - mean, 0.0)
        var = jnp.sum(cen * cen, axis=1, keepdims=True) * inv_n
    y = (acc - mean) * jax.lax.rsqrt(var + _EPS)
    y_ref[0] = _apply_act(y, act)


def _conv_bias_stats_kernel(p_ref, w_ref, b_ref, y_ref, sum_ref, ssq_ref, *,
                            tp, p_valid, p_pad):
    """Pass A of the P-tiled conv+IN: conv+bias tile, accumulate channel stats."""
    t = pl.program_id(1)
    acc = jnp.dot(w_ref[...], p_ref[0], preferred_element_type=jnp.float32)
    acc = acc + b_ref[...]
    y_ref[0] = acc

    if p_valid == p_pad:
        am = acc
    else:
        cols = jax.lax.broadcasted_iota(jnp.int32, acc.shape, 1) + t * tp
        am = jnp.where(cols < p_valid, acc, 0.0)
    s = jnp.sum(am, axis=1, keepdims=True)               # (Cout, 1)
    sq = jnp.sum(am * am, axis=1, keepdims=True)

    @pl.when(t == 0)
    def _():
        sum_ref[...] = jnp.zeros_like(sum_ref)
        ssq_ref[...] = jnp.zeros_like(ssq_ref)

    sum_ref[0] = sum_ref[0] + s
    ssq_ref[0] = ssq_ref[0] + sq


def _in_act_kernel(y_ref, sum_ref, ssq_ref, o_ref, *, p_valid, act):
    """Pass B of the P-tiled conv+IN: normalize with global stats + activation."""
    inv_n = 1.0 / p_valid
    mean = sum_ref[0] * inv_n                            # (Cout, 1)
    var = jnp.maximum(ssq_ref[0] * inv_n - mean * mean, 0.0)
    y = (y_ref[0] - mean) * jax.lax.rsqrt(var + _EPS)
    o_ref[0] = _apply_act(y, act)


# ---------------------------------------------------------------------------
# Conv wrapper (im2col matmul, lane-dense (Cout, P) output, bf16 MXU feed)
# ---------------------------------------------------------------------------
def _im2col_nchw(x, K, pad):
    """NCHW -> (N, Cin*K*K, Ho*Wo).  Feature order matches OIHW weight flatten."""
    N, C, H, W = x.shape
    xp = jnp.pad(x, ((0, 0), (0, 0), (pad, pad), (pad, pad)))
    Ho, Wo = H + 2 * pad - K + 1, W + 2 * pad - K + 1
    cols = []
    for kh in range(K):
        for kw in range(K):
            cols.append(xp[:, :, kh:kh + Ho, kw:kw + Wo])
    col = jnp.stack(cols, axis=2)                        # (N, C, K*K, Ho, Wo)
    return col.reshape(N, C * K * K, Ho * Wo), Ho, Wo    # (N, F, P)


def conv_in_act(x, p, *, norm, act, max_tp=2048):
    """Conv2d(3x3, pad 1) [+ InstanceNorm2d(affine=False)] [+ ReLU/LeakyReLU].

    max_tp must be a multiple of 128; it caps the spatial (lane) tile so the
    per-step VMEM footprint stays small on 64 MiB-VMEM chips (v7x).
    """
    w, b = p["w"], p["b"]
    Cout, Cin, K, _ = w.shape
    # TODO(synk): the 9x im2col expansion is still plain-JAX HBM traffic; a fully
    # fused conv would gather the K*K shifted rows inside the kernel.
    col, Ho, Wo = _im2col_nchw(x.astype(jnp.bfloat16), K, K // 2)
    N, F, P = col.shape

    P128 = _round_up(P, 128)
    TP = P128 if P128 <= max_tp else max_tp
    PT = _round_up(P128, TP) // TP
    P_pad = TP * PT
    if P_pad > P:
        col = jnp.pad(col, ((0, 0), (0, 0), (0, P_pad - P)))

    wmat = w.reshape(Cout, F).astype(jnp.bfloat16)
    bvec = b if b is not None else jnp.zeros((Cout,), jnp.float32)
    bvec = bvec.reshape(Cout, 1).astype(jnp.float32)

    cost = pl.CostEstimate(
        flops=2 * N * P_pad * F * Cout,
        transcendentals=0,
        bytes_accessed=col.size * 2 + wmat.size * 2 + N * Cout * P_pad * 4)

    if norm and PT == 1:
        # Fully fused conv + bias + InstanceNorm + act (whole P in one tile).
        kern = functools.partial(_conv_in_act_fused_kernel,
                                 tp=P_pad, p_valid=P, act=act)
        y = pl.pallas_call(
            kern,
            out_shape=jax.ShapeDtypeStruct((N, Cout, P_pad), jnp.float32),
            grid=(N,),
            in_specs=[
                pl.BlockSpec((1, F, P_pad), lambda n: (n, 0, 0)),
                pl.BlockSpec((Cout, F), lambda n: (0, 0)),
                pl.BlockSpec((Cout, 1), lambda n: (0, 0)),
            ],
            out_specs=pl.BlockSpec((1, Cout, P_pad), lambda n: (n, 0, 0)),
            compiler_params=pltpu.CompilerParams(
                dimension_semantics=("parallel",),
                vmem_limit_bytes=_VMEM_LIMIT),
            cost_estimate=cost,
        )(col, wmat, bvec)
    elif norm:
        # Pass A: tiled conv + bias, sum/sumsq accumulated in resident outputs
        # across the 'arbitrary' P axis.
        kern = functools.partial(_conv_bias_stats_kernel,
                                 tp=TP, p_valid=P, p_pad=P_pad)
        y, ssum, ssq = pl.pallas_call(
            kern,
            out_shape=(jax.ShapeDtypeStruct((N, Cout, P_pad), jnp.float32),
                       jax.ShapeDtypeStruct((N, Cout, 1), jnp.float32),
                       jax.ShapeDtypeStruct((N, Cout, 1), jnp.float32)),
            grid=(N, PT),
            in_specs=[
                pl.BlockSpec((1, F, TP), lambda n, t: (n, 0, t)),
                pl.BlockSpec((Cout, F), lambda n, t: (0, 0)),
                pl.BlockSpec((Cout, 1), lambda n, t: (0, 0)),
            ],
            out_specs=(pl.BlockSpec((1, Cout, TP), lambda n, t: (n, 0, t)),
                       pl.BlockSpec((1, Cout, 1), lambda n, t: (n, 0, 0)),
                       pl.BlockSpec((1, Cout, 1), lambda n, t: (n, 0, 0))),
            compiler_params=pltpu.CompilerParams(
                dimension_semantics=("parallel", "arbitrary"),
                vmem_limit_bytes=_VMEM_LIMIT),
            cost_estimate=cost,
        )(col, wmat, bvec)
        # Pass B: normalize with global stats + activation.
        kern = functools.partial(_in_act_kernel, p_valid=P, act=act)
        y = pl.pallas_call(
            kern,
            out_shape=jax.ShapeDtypeStruct((N, Cout, P_pad), jnp.float32),
            grid=(N, PT),
            in_specs=[
                pl.BlockSpec((1, Cout, TP), lambda n, t: (n, 0, t)),
                pl.BlockSpec((1, Cout, 1), lambda n, t: (n, 0, 0)),
                pl.BlockSpec((1, Cout, 1), lambda n, t: (n, 0, 0)),
            ],
            out_specs=pl.BlockSpec((1, Cout, TP), lambda n, t: (n, 0, t)),
            compiler_params=pltpu.CompilerParams(
                dimension_semantics=("parallel", "parallel"),
                vmem_limit_bytes=_VMEM_LIMIT),
        )(y, ssum, ssq)
    else:
        # Plain conv + bias (+ optional act), tiled over P.
        kern = functools.partial(_conv_bias_act_kernel, act=act)
        y = pl.pallas_call(
            kern,
            out_shape=jax.ShapeDtypeStruct((N, Cout, P_pad), jnp.float32),
            grid=(N, PT),
            in_specs=[
                pl.BlockSpec((1, F, TP), lambda n, t: (n, 0, t)),
                pl.BlockSpec((Cout, F), lambda n, t: (0, 0)),
                pl.BlockSpec((Cout, 1), lambda n, t: (0, 0)),
            ],
            out_specs=pl.BlockSpec((1, Cout, TP), lambda n, t: (n, 0, t)),
            compiler_params=pltpu.CompilerParams(
                dimension_semantics=("parallel", "parallel"),
                vmem_limit_bytes=_VMEM_LIMIT),
            cost_estimate=cost,
        )(col, wmat, bvec)

    if P_pad > P:
        y = y[:, :, :P]
    return y.reshape(N, Cout, Ho, Wo)      # no transpose: (N, Cout, P) is NCHW


# ---------------------------------------------------------------------------
# Layout / resize glue (plain JAX)
# ---------------------------------------------------------------------------
def upsample_bilinear(x, size):
    """F.interpolate(..., mode='bilinear', align_corners=False) equivalent."""
    N, C, H, W = x.shape
    size = (int(size[0]), int(size[1]))
    if (H, W) == size:
        return x
    return jax.image.resize(x, (N, C, size[0], size[1]),
                            method="bilinear", antialias=False)


# ---------------------------------------------------------------------------
# UNetDecoderBlock
# ---------------------------------------------------------------------------
def init_decoder_block(key, channel_list, is_last):
    assert len(channel_list) == 4, "Incorrect length of channel_list"
    c0, c1, c2, c3 = channel_list
    ks = jax.random.split(key, 6)

    def conv_p(kw, kb, cin, cout, bias=True):
        w = 0.1 * jax.random.normal(kw, (cout, cin, 3, 3), jnp.float32)
        b = 0.1 * jax.random.normal(kb, (cout,), jnp.float32) if bias else None
        return {"w": w, "b": b}

    return {
        "c1": conv_p(ks[0], ks[1], c0, c1, bias=not is_last),
        "c2": conv_p(ks[2], ks[3], c1, c2),
        "c3": conv_p(ks[4], ks[5], c2, c3),
        "is_last": is_last,
    }


def unet_decoder_block_forward(params, enc1, enc2, hist_enc1, hist_enc2,
                               upsample_size, *, max_tp=2048):
    if isinstance(upsample_size, int):
        size = (upsample_size, upsample_size)
    else:
        size = (int(upsample_size[0]), int(upsample_size[1]))
    e1 = upsample_bilinear(enc1, size)
    e2 = upsample_bilinear(enc2, size)
    h1 = upsample_bilinear(hist_enc1, size)
    h2 = upsample_bilinear(hist_enc2, size)
    x = jnp.concatenate([e1, e2, h1, h2], axis=1)

    # nn.ReLU(True): folded into the plain-JAX glue (XLA fuses it with the resize).
    x = jnp.maximum(x, 0.0)
    # nn.Upsample(scale_factor=2, mode='bilinear')
    x = upsample_bilinear(x, (2 * size[0], 2 * size[1]))

    is_last = params["is_last"]
    x = conv_in_act(x, params["c1"], norm=True, act="relu", max_tp=max_tp)
    x = conv_in_act(x, params["c2"], norm=True, act="relu", max_tp=max_tp)
    x = conv_in_act(x, params["c3"], norm=not is_last, act=None, max_tp=max_tp)
    return x


# ---------------------------------------------------------------------------
# Pure-JAX reference (same bf16 conv feed) for a numerical self-check
# ---------------------------------------------------------------------------
def _conv2d_ref(x, w, b):
    y = jax.lax.conv_general_dilated(
        x.astype(jnp.bfloat16), w.astype(jnp.bfloat16),
        window_strides=(1, 1), padding=((1, 1), (1, 1)),
        dimension_numbers=("NCHW", "OIHW", "NCHW"),
        preferred_element_type=jnp.float32)
    if b is not None:
        y = y + b.reshape(1, -1, 1, 1)
    return y


def _instance_norm_ref(x, eps=_EPS):
    mean = jnp.mean(x, axis=(2, 3), keepdims=True)
    var = jnp.mean((x - mean) ** 2, axis=(2, 3), keepdims=True)
    return (x - mean) * jax.lax.rsqrt(var + eps)


def unet_decoder_block_ref(params, enc1, enc2, hist_enc1, hist_enc2, upsample_size):
    size = (upsample_size, upsample_size)
    e1 = upsample_bilinear(enc1, size)
    e2 = upsample_bilinear(enc2, size)
    h1 = upsample_bilinear(hist_enc1, size)
    h2 = upsample_bilinear(hist_enc2, size)
    x = jnp.concatenate([e1, e2, h1, h2], axis=1)
    x = jnp.maximum(x, 0.0)
    x = upsample_bilinear(x, (2 * size[0], 2 * size[1]))
    is_last = params["is_last"]
    x = jnp.maximum(_instance_norm_ref(
        _conv2d_ref(x, params["c1"]["w"], params["c1"]["b"])), 0.0)
    x = jnp.maximum(_instance_norm_ref(
        _conv2d_ref(x, params["c2"]["w"], params["c2"]["b"])), 0.0)
    x = _conv2d_ref(x, params["c3"]["w"], params["c3"]["b"])
    if not is_last:
        x = _instance_norm_ref(x)
    return x


# ---------------------------------------------------------------------------
if __name__ == "__main__":
    key = jax.random.PRNGKey(0)
    k1, k2, k3, k4, kp1, kp2 = jax.random.split(key, 6)

    N = 2
    enc1 = jax.random.normal(k1, (N, 16, 4, 4), jnp.float32)
    enc2 = jax.random.normal(k2, (N, 8, 8, 8), jnp.float32)
    hist1 = jax.random.normal(k3, (N, 4, 8, 8), jnp.float32)
    hist2 = jax.random.normal(k4, (N, 4, 8, 8), jnp.float32)
    up_size = 8      # concat at 8x8 -> conv layers run at 16x16 (P = 256)

    c0 = 16 + 8 + 4 + 4                       # enc1 + enc2 + hist1 + hist2 channels
    params_mid = init_decoder_block(kp1, [c0, 16, 16, 8], is_last=False)
    params_last = init_decoder_block(kp2, [c0, 16, 8, 3], is_last=True)

    @jax.jit
    def run_mid(a, b, c, d):
        return unet_decoder_block_forward(params_mid, a, b, c, d, up_size)

    @jax.jit
    def run_last(a, b, c, d):
        return unet_decoder_block_forward(params_last, a, b, c, d, up_size)

    @jax.jit
    def run_mid_tiled(a, b, c, d):   # exercises the P-tiled two-pass IN path
        return unet_decoder_block_forward(params_mid, a, b, c, d, up_size, max_tp=128)

    @jax.jit
    def run_last_tiled(a, b, c, d):  # exercises the tiled norm-less conv path
        return unet_decoder_block_forward(params_last, a, b, c, d, up_size, max_tp=128)

    out_mid = jax.block_until_ready(run_mid(enc1, enc2, hist1, hist2))
    out_last = jax.block_until_ready(run_last(enc1, enc2, hist1, hist2))
    out_mid_t = jax.block_until_ready(run_mid_tiled(enc1, enc2, hist1, hist2))
    out_last_t = jax.block_until_ready(run_last_tiled(enc1, enc2, hist1, hist2))

    assert out_mid.shape == (N, 8, 16, 16)
    assert out_last.shape == (N, 3, 16, 16)

    ref_mid = unet_decoder_block_ref(params_mid, enc1, enc2, hist1, hist2, up_size)
    ref_last = unet_decoder_block_ref(params_last, enc1, enc2, hist1, hist2, up_size)

    err_mid = float(jnp.max(jnp.abs(out_mid - ref_mid)))
    err_last = float(jnp.max(jnp.abs(out_last - ref_last)))
    err_t1 = float(jnp.max(jnp.abs(out_mid_t - out_mid)))
    err_t2 = float(jnp.max(jnp.abs(out_last_t - out_last)))
    assert err_mid < 5e-2 and err_last < 5e-2, (err_mid, err_last)
    assert err_t1 < 1e-2 and err_t2 < 1e-2, (err_t1, err_t2)

    print("KERNEL_OK")
</pallas_src>

<mosaic_0001>
module attributes {stable_mosaic.version = 11 : i64} {
  func.func @_conv_in_act_fused_kernel(%arg0: i32, %arg1: memref<1x288x256xbf16, #tpu.memory_space<vmem>>, %arg2: memref<16x288xbf16, #tpu.memory_space<vmem>>, %arg3: memref<16x1xf32, #tpu.memory_space<vmem>>, %arg4: memref<1x16x256xf32, #tpu.memory_space<vmem>>) attributes {dimension_semantics = [#tpu.dimension_semantics<parallel>], iteration_bounds = array<i64: 2>, scalar_prefetch = 0 : i64, scratch_operands = 0 : i64, tpu.core_type = #tpu.core_type<tc>, window_params = [{transform_indices = @transform_0, window_bounds = array<i64: 1, 288, 256>}, {pipeline_mode = #tpu.pipeline_mode<synchronous>, transform_indices = @transform_1, window_bounds = array<i64: 16, 288>}, {pipeline_mode = #tpu.pipeline_mode<synchronous>, transform_indices = @transform_2, window_bounds = array<i64: 16, 1>}, {transform_indices = @transform_3, window_bounds = array<i64: 1, 16, 256>}]} {
    %c0 = arith.constant 0 : index
    %c0_0 = arith.constant 0 : index
    %0 = vector.load %arg2[%c0, %c0_0] : memref<16x288xbf16, #tpu.memory_space<vmem>>, vector<16x288xbf16>
    %c0_1 = arith.constant 0 : index
    %c0_2 = arith.constant 0 : index
    %c0_3 = arith.constant 0 : index
    %1 = vector.load %arg1[%c0_1, %c0_2, %c0_3] : memref<1x288x256xbf16, #tpu.memory_space<vmem>>, vector<1x288x256xbf16>
    %2 = vector.shape_cast %1 : vector<1x288x256xbf16> to vector<288x256xbf16>
    %cst = arith.constant dense<0.000000e+00> : vector<16x256xf32>
    %3 = tpu.matmul %0, %2, %cst {dimension_numbers = #tpu.dot_dimension_numbers<[1], [0], [0], [1], [0, 0, 1, 1], [], []>} : vector<16x288xbf16>, vector<288x256xbf16>, vector<16x256xf32> -> vector<16x256xf32>
    %c0_4 = arith.constant 0 : index
    %c0_5 = arith.constant 0 : index
    %4 = vector.load %arg3[%c0_4, %c0_5] : memref<16x1xf32, #tpu.memory_space<vmem>>, vector<16x1xf32>
    %5 = vector.broadcast %4 : vector<16x1xf32> to vector<16x256xf32>
    %6 = arith.addf %3, %5 : vector<16x256xf32>
    %cst_6 = arith.constant dense<0.000000e+00> : vector<16xf32>
    %7 = vector.multi_reduction <add>, %6, %cst_6 [1] : vector<16x256xf32> to vector<16xf32>
    %8 = vector.shape_cast %7 : vector<16xf32> to vector<16x1xf32>
    %cst_7 = arith.constant 3.906250e-03 : f32
    %9 = vector.broadcast %cst_7 : f32 to vector<16x1xf32>
    %10 = arith.mulf %8, %9 : vector<16x1xf32>
    %11 = vector.broadcast %10 : vector<16x1xf32> to vector<16x256xf32>
    %12 = arith.subf %6, %11 : vector<16x256xf32>
    %13 = arith.mulf %12, %12 : vector<16x256xf32>
    %cst_8 = arith.constant dense<0.000000e+00> : vector<16xf32>
    %14 = vector.multi_reduction <add>, %13, %cst_8 [1] : vector<16x256xf32> to vector<16xf32>
    %15 = vector.shape_cast %14 : vector<16xf32> to vector<16x1xf32>
    %cst_9 = arith.constant 3.906250e-03 : f32
    %16 = vector.broadcast %cst_9 : f32 to vector<16x1xf32>
    %17 = arith.mulf %15, %16 : vector<16x1xf32>
    %18 = vector.broadcast %10 : vector<16x1xf32> to vector<16x256xf32>
    %19 = arith.subf %6, %18 : vector<16x256xf32>
    %cst_10 = arith.constant 9.99999974E-6 : f32
    %20 = vector.broadcast %cst_10 : f32 to vector<16x1xf32>
    %21 = arith.addf %17, %20 : vector<16x1xf32>
    %22 = math.rsqrt %21 : vector<16x1xf32>
    %23 = vector.broadcast %22 : vector<16x1xf32> to vector<16x256xf32>
    %24 = arith.mulf %19, %23 : vector<16x256xf32>
    %cst_11 = arith.constant 0.000000e+00 : f32
    %25 = vector.broadcast %cst_11 : f32 to vector<16x256xf32>
    %26 = arith.maximumf %24, %25 : vector<16x256xf32>
    %c0_12 = arith.constant 0 : index
    %c0_13 = arith.constant 0 : index
    %c0_14 = arith.constant 0 : index
    %27 = vector.load %arg4[%c0_12, %c0_13, %c0_14] : memref<1x16x256xf32, #tpu.memory_space<vmem>>, vector<1x16x256xf32>
    %28 = vector.shape_cast %27 : vector<1x16x256xf32> to vector<16x256xf32>
    %29 = vector.shape_cast %26 : vector<16x256xf32> to vector<1x16x256xf32>
    tpu.vector_store %arg4[%c0_12, %c0_13, %c0_14], %29 {strides = array<i32>} : memref<1x16x256xf32, #tpu.memory_space<vmem>>, vector<1x16x256xf32>,
    return
  }
  func.func @transform_0(%arg0: i32) -> (i32, i32, i32) {
    %c0_i32 = arith.constant 0 : i32
    %c0_i32_0 = arith.constant 0 : i32
    %c0_i32_1 = arith.constant 0 : i32
    return %arg0, %c0_i32, %c0_i32_0 : i32, i32, i32
  }
  func.func @transform_1(%arg0: i32) -> (i32, i32) {
    %c0_i32 = arith.constant 0 : i32
    %c0_i32_0 = arith.constant 0 : i32
    %c0_i32_1 = arith.constant 0 : i32
    return %c0_i32, %c0_i32_0 : i32, i32
  }
  func.func @transform_2(%arg0: i32) -> (i32, i32) {
    %c0_i32 = arith.constant 0 : i32
    %c0_i32_0 = arith.constant 0 : i32
    %c0_i32_1 = arith.constant 0 : i32
    return %c0_i32, %c0_i32_0 : i32, i32
  }
  func.func @transform_3(%arg0: i32) -> (i32, i32, i32) {
    %c0_i32 = arith.constant 0 : i32
    %c0_i32_0 = arith.constant 0 : i32
    %c0_i32_1 = arith.constant 0 : i32
    return %arg0, %c0_i32, %c0_i32_0 : i32, i32, i32
  }
}

module attributes {stable_mosaic.version = 11 : i64} {
  func.func @_conv_in_act_fused_kernel(%arg0: i32, %arg1: memref<1x144x256xbf16, #tpu.memory_space<vmem>>, %arg2: memref<16x144xbf16, #tpu.memory_space<vmem>>, %arg3: memref<16x1xf32, #tpu.memory_space<vmem>>, %arg4: memref<1x16x256xf32, #tpu.memory_space<vmem>>) attributes {dimension_semantics = [#tpu.dimension_semantics<parallel>], iteration_bounds = array<i64: 2>, scalar_prefetch = 0 : i64, scratch_operands = 0 : i64, tpu.core_type = #tpu.core_type<tc>, window_params = [{transform_indices = @transform_0, window_bounds = array<i64: 1, 144, 256>}, {pipeline_mode = #tpu.pipeline_mode<synchronous>, transform_indices = @transform_1, window_bounds = array<i64: 16, 144>}, {pipeline_mode = #tpu.pipeline_mode<synchronous>, transform_indices = @transform_2, window_bounds = array<i64: 16, 1>}, {transform_indices = @transform_3, window_bounds = array<i64: 1, 16, 256>}]} {
    %c0 = arith.constant 0 : index
    %c0_0 = arith.constant 0 : index
    %0 = vector.load %arg2[%c0, %c0_0] : memref<16x144xbf16, #tpu.memory_space<vmem>>, vector<16x144xbf16>
    %c0_1 = arith.constant 0 : index
    %c0_2 = arith.constant 0 : index
    %c0_3 = arith.constant 0 : index
    %1 = vector.load %arg1[%c0_1, %c0_2, %c0_3] : memref<1x144x256xbf16, #tpu.memory_space<vmem>>, vector<1x144x256xbf16>
    %2 = vector.shape_cast %1 : vector<1x144x256xbf16> to vector<144x256xbf16>
    %cst = arith.constant dense<0.000000e+00> : vector<16x256xf32>
    %3 = tpu.matmul %0, %2, %cst {dimension_numbers = #tpu.dot_dimension_numbers<[1], [0], [0], [1], [0, 0, 1, 1], [], []>} : vector<16x144xbf16>, vector<144x256xbf16>, vector<16x256xf32> -> vector<16x256xf32>
    %c0_4 = arith.constant 0 : index
    %c0_5 = arith.constant 0 : index
    %4 = vector.load %arg3[%c0_4, %c0_5] : memref<16x1xf32, #tpu.memory_space<vmem>>, vector<16x1xf32>
    %5 = vector.broadcast %4 : vector<16x1xf32> to vector<16x256xf32>
    %6 = arith.addf %3, %5 : vector<16x256xf32>
    %cst_6 = arith.constant dense<0.000000e+00> : vector<16xf32>
    %7 = vector.multi_reduction <add>, %6, %cst_6 [1] : vector<16x256xf32> to vector<16xf32>
    %8 = vector.shape_cast %7 : vector<16xf32> to vector<16x1xf32>
    %cst_7 = arith.constant 3.906250e-03 : f32
    %9 = vector.broadcast %cst_7 : f32 to vector<16x1xf32>
    %10 = arith.mulf %8, %9 : vector<16x1xf32>
    %11 = vector.broadcast %10 : vector<16x1xf32> to vector<16x256xf32>
    %12 = arith.subf %6, %11 : vector<16x256xf32>
    %13 = arith.mulf %12, %12 : vector<16x256xf32>
    %cst_8 = arith.constant dense<0.000000e+00> : vector<16xf32>
    %14 = vector.multi_reduction <add>, %13, %cst_8 [1] : vector<16x256xf32> to vector<16xf32>
    %15 = vector.shape_cast %14 : vector<16xf32> to vector<16x1xf32>
    %cst_9 = arith.constant 3.906250e-03 : f32
    %16 = vector.broadcast %cst_9 : f32 to vector<16x1xf32>
    %17 = arith.mulf %15, %16 : vector<16x1xf32>
    %18 = vector.broadcast %10 : vector<16x1xf32> to vector<16x256xf32>
    %19 = arith.subf %6, %18 : vector<16x256xf32>
    %cst_10 = arith.constant 9.99999974E-6 : f32
    %20 = vector.broadcast %cst_10 : f32 to vector<16x1xf32>
    %21 = arith.addf %17, %20 : vector<16x1xf32>
    %22 = math.rsqrt %21 : vector<16x1xf32>
    %23 = vector.broadcast %22 : vector<16x1xf32> to vector<16x256xf32>
    %24 = arith.mulf %19, %23 : vector<16x256xf32>
    %cst_11 = arith.constant 0.000000e+00 : f32
    %25 = vector.broadcast %cst_11 : f32 to vector<16x256xf32>
    %26 = arith.maximumf %24, %25 : vector<16x256xf32>
    %c0_12 = arith.constant 0 : index
    %c0_13 = arith.constant 0 : index
    %c0_14 = arith.constant 0 : index
    %27 = vector.load %arg4[%c0_12, %c0_13, %c0_14] : memref<1x16x256xf32, #tpu.memory_space<vmem>>, vector<1x16x256xf32>
    %28 = vector.shape_cast %27 : vector<1x16x256xf32> to vector<16x256xf32>
    %29 = vector.shape_cast %26 : vector<16x256xf32> to vector<1x16x256xf32>
    tpu.vector_store %arg4[%c0_12, %c0_13, %c0_14], %29 {strides = array<i32>} : memref<1x16x256xf32, #tpu.memory_space<vmem>>, vector<1x16x256xf32>,
    return
  }
  func.func @transform_0(%arg0: i32) -> (i32, i32, i32) {
    %c0_i32 = arith.constant 0 : i32
    %c0_i32_0 = arith.constant 0 : i32
    %c0_i32_1 = arith.constant 0 : i32
    return %arg0, %c0_i32, %c0_i32_0 : i32, i32, i32
  }
  func.func @transform_1(%arg0: i32) -> (i32, i32) {
    %c0_i32 = arith.constant 0 : i32
    %c0_i32_0 = arith.constant 0 : i32
    %c0_i32_1 = arith.constant 0 : i32
    return %c0_i32, %c0_i32_0 : i32, i32
  }
  func.func @transform_2(%arg0: i32) -> (i32, i32) {
    %c0_i32 = arith.constant 0 : i32
    %c0_i32_0 = arith.constant 0 : i32
    %c0_i32_1 = arith.constant 0 : i32
    return %c0_i32, %c0_i32_0 : i32, i32
  }
  func.func @transform_3(%arg0: i32) -> (i32, i32, i32) {
    %c0_i32 = arith.constant 0 : i32
    %c0_i32_0 = arith.constant 0 : i32
    %c0_i32_1 = arith.constant 0 : i32
    return %arg0, %c0_i32, %c0_i32_0 : i32, i32, i32
  }
}

module attributes {stable_mosaic.version = 11 : i64} {
  func.func @_conv_in_act_fused_kernel(%arg0: i32, %arg1: memref<1x144x256xbf16, #tpu.memory_space<vmem>>, %arg2: memref<8x144xbf16, #tpu.memory_space<vmem>>, %arg3: memref<8x1xf32, #tpu.memory_space<vmem>>, %arg4: memref<1x8x256xf32, #tpu.memory_space<vmem>>) attributes {dimension_semantics = [#tpu.dimension_semantics<parallel>], iteration_bounds = array<i64: 2>, scalar_prefetch = 0 : i64, scratch_operands = 0 : i64, tpu.core_type = #tpu.core_type<tc>, window_params = [{transform_indices = @transform_0, window_bounds = array<i64: 1, 144, 256>}, {pipeline_mode = #tpu.pipeline_mode<synchronous>, transform_indices = @transform_1, window_bounds = array<i64: 8, 144>}, {pipeline_mode = #tpu.pipeline_mode<synchronous>, transform_indices = @transform_2, window_bounds = array<i64: 8, 1>}, {transform_indices = @transform_3, window_bounds = array<i64: 1, 8, 256>}]} {
    %c0 = arith.constant 0 : index
    %c0_0 = arith.constant 0 : index
    %0 = vector.load %arg2[%c0, %c0_0] : memref<8x144xbf16, #tpu.memory_space<vmem>>, vector<8x144xbf16>
    %c0_1 = arith.constant 0 : index
    %c0_2 = arith.constant 0 : index
    %c0_3 = arith.constant 0 : index
    %1 = vector.load %arg1[%c0_1, %c0_2, %c0_3] : memref<1x144x256xbf16, #tpu.memory_space<vmem>>, vector<1x144x256xbf16>
    %2 = vector.shape_cast %1 : vector<1x144x256xbf16> to vector<144x256xbf16>
    %cst = arith.constant dense<0.000000e+00> : vector<8x256xf32>
    %3 = tpu.matmul %0, %2, %cst {dimension_numbers = #tpu.dot_dimension_numbers<[1], [0], [0], [1], [0, 0, 1, 1], [], []>} : vector<8x144xbf16>, vector<144x256xbf16>, vector<8x256xf32> -> vector<8x256xf32>
    %c0_4 = arith.constant 0 : index
    %c0_5 = arith.constant 0 : index
    %4 = vector.load %arg3[%c0_4, %c0_5] : memref<8x1xf32, #tpu.memory_space<vmem>>, vector<8x1xf32>
    %5 = vector.broadcast %4 : vector<8x1xf32> to vector<8x256xf32>
    %6 = arith.addf %3, %5 : vector<8x256xf32>
    %cst_6 = arith.constant dense<0.000000e+00> : vector<8xf32>
    %7 = vector.multi_reduction <add>, %6, %cst_6 [1] : vector<8x256xf32> to vector<8xf32>
    %8 = vector.shape_cast %7 : vector<8xf32> to vector<8x1xf32>
    %cst_7 = arith.constant 3.906250e-03 : f32
    %9 = vector.broadcast %cst_7 : f32 to vector<8x1xf32>
    %10 = arith.mulf %8, %9 : vector<8x1xf32>
    %11 = vector.broadcast %10 : vector<8x1xf32> to vector<8x256xf32>
    %12 = arith.subf %6, %11 : vector<8x256xf32>
    %13 = arith.mulf %12, %12 : vector<8x256xf32>
    %cst_8 = arith.constant dense<0.000000e+00> : vector<8xf32>
    %14 = vector.multi_reduction <add>, %13, %cst_8 [1] : vector<8x256xf32> to vector<8xf32>
    %15 = vector.shape_cast %14 : vector<8xf32> to vector<8x1xf32>
    %cst_9 = arith.constant 3.906250e-03 : f32
    %16 = vector.broadcast %cst_9 : f32 to vector<8x1xf32>
    %17 = arith.mulf %15, %16 : vector<8x1xf32>
    %18 = vector.broadcast %10 : vector<8x1xf32> to vector<8x256xf32>
    %19 = arith.subf %6, %18 : vector<8x256xf32>
    %cst_10 = arith.constant 9.99999974E-6 : f32
    %20 = vector.broadcast %cst_10 : f32 to vector<8x1xf32>
    %21 = arith.addf %17, %20 : vector<8x1xf32>
    %22 = math.rsqrt %21 : vector<8x1xf32>
    %23 = vector.broadcast %22 : vector<8x1xf32> to vector<8x256xf32>
    %24 = arith.mulf %19, %23 : vector<8x256xf32>
    %c0_11 = arith.constant 0 : index
    %c0_12 = arith.constant 0 : index
    %c0_13 = arith.constant 0 : index
    %25 = vector.load %arg4[%c0_11, %c0_12, %c0_13] : memref<1x8x256xf32, #tpu.memory_space<vmem>>, vector<1x8x256xf32>
    %26 = vector.shape_cast %25 : vector<1x8x256xf32> to vector<8x256xf32>
    %27 = vector.shape_cast %24 : vector<8x256xf32> to vector<1x8x256xf32>
    tpu.vector_store %arg4[%c0_11, %c0_12, %c0_13], %27 {strides = array<i32>} : memref<1x8x256xf32, #tpu.memory_space<vmem>>, vector<1x8x256xf32>,
    return
  }
  func.func @transform_0(%arg0: i32) -> (i32, i32, i32) {
    %c0_i32 = arith.constant 0 : i32
    %c0_i32_0 = arith.constant 0 : i32
    %c0_i32_1 = arith.constant 0 : i32
    return %arg0, %c0_i32, %c0_i32_0 : i32, i32, i32
  }
  func.func @transform_1(%arg0: i32) -> (i32, i32) {
    %c0_i32 = arith.constant 0 : i32
    %c0_i32_0 = arith.constant 0 : i32
    %c0_i32_1 = arith.constant 0 : i32
    return %c0_i32, %c0_i32_0 : i32, i32
  }
  func.func @transform_2(%arg0: i32) -> (i32, i32) {
    %c0_i32 = arith.constant 0 : i32
    %c0_i32_0 = arith.constant 0 : i32
    %c0_i32_1 = arith.constant 0 : i32
    return %c0_i32, %c0_i32_0 : i32, i32
  }
  func.func @transform_3(%arg0: i32) -> (i32, i32, i32) {
    %c0_i32 = arith.constant 0 : i32
    %c0_i32_0 = arith.constant 0 : i32
    %c0_i32_1 = arith.constant 0 : i32
    return %arg0, %c0_i32, %c0_i32_0 : i32, i32, i32
  }
}

</mosaic_0001>

<bundles_post_ra>
// kernel: run_mid.3
= control target key start
LH: loop header
LB: loop body
LE: loop exit
PB: predicated region body
PF: predicated region fallthrough
CT: control target
= control target key end

     0   :  { %s872_s12 = smov 0   ;;  %s997_s0 = inlined_call_operand.vmem [shape: bf16[2,288,256], index: 0, kind: input, shape index: {}]   ;;  %s998_s1 = inlined_call_operand.vmem [shape: bf16[16,288], index: 1, kind: input, shape index: {}]   ;;  %s999_s2 = inlined_call_operand.vmem [shape: f32[16,1], index: 2, kind: input, shape index: {}]   ;;  %s1000_s3 = inlined_call_operand.vmem [shape: f32[2,16,256], index: 3, kind: output, shape index: {}]  }
   0x1 LB: > { %s620_s13 = sadd.s32 4294967295, %s849_s12   ;;  %p624_p0 = scmp.ge.s32.totalorder %s849_s12, 1  ;;  %s849_s12 = sphi %s872_s12, %s13_s12  }
   0x2   : > { %p137_p1 = scmp.lt.s32.totalorder %s849_s12, 3 }
   0x4   : > { %p138_p2 = pnand %p624_p0, %p137_p1 }
   0x5   : > { %p161_p3 = scmp.lt.s32.totalorder (!%p138_p2), %s620_s13, 1 }
   0x6   : > { %141 = sbr.rel (%p138_p2) target bundleno = 472 (0x1d8), region = 32 }
   0xb   : > { %s1002_s13 = smov (!%p161_p3, %s620_s13), 1  ;;  %vm419_vm0 = vcmask 261120   ;;  %v638_v12 = vld [vmem:[%s998_s1 + $0x8] sm:$0xf]  ;;  %v791_v13 = vld [vmem:[%s998_s1 + $0x10] sm:$0xf0] }
   0xc   : > { %s828_s14 = smul.u32 288, %s1002_s13  ;;  %v918_v36 = vor.u32 %v791_v13, %v638_v12  ;;  %s788_s7 = sshll.u32 %s1002_s13, 5 }
   0xd   : > { %s170_s10 = scalar_lea.vmem %s1000_s3, %s788_s7 }
   0xe   : > { %s886_s17 = scalar_lea.vmem %s997_s0, %s828_s14 }
   0xf   : > { %v698_v0 = vld [vmem:[%s886_s17 + $0x70] sm:$0xf]  ;;  %v807_v1 = vld [vmem:[%s886_s17 + $0x74] sm:$0xf0]  ;;  %v806_v5 = vld [vmem:[%s886_s17 + $0x74] sm:$0xf] }
  0x10   : > { %v778_v2 = vld [vmem:[%s886_s17 + $0x110] sm:$0xf]  ;;  %v699_v3 = vor.u32 %v807_v1, %v698_v0  ;;  %v827_v4 = vld [vmem:[%s886_s17 + $0x114] sm:$0xf0]  ;;  %v700_v6 = vld [vmem:[%s886_s17 + $0x78] sm:$0xf0] }
  0x11   : > { %v779_v7 = vor.u32 %v827_v4, %v778_v2  ;;  %v703_v8 = vor.u32 %v806_v5, %v700_v6  ;;  %v762_v9 = vld [vmem:[%s886_s17 + $0xf0] sm:$0xf]  ;;  %v823_v10 = vld [vmem:[%s886_s17 + $0xf4] sm:$0xf0]  ;;  %v690_v11 = vld [vmem:[%s886_s17 + $0x60] sm:$0xf] }
  0x12   : > { %423 = vmatpush.bf16.msra.mxu0 %v699_v3  ;;  %v763_v14 = vor.u32 %v823_v10, %v762_v9  ;;  %v805_v15 = vld [vmem:[%s886_s17 + $0x64] sm:$0xf0]  ;;  %v770_v16 = vld [vmem:[%s886_s17 + $0x100] sm:$0xf]  ;;  %v804_v20 = vld [vmem:[%s886_s17 + $0x64] sm:$0xf] }
  0x13   : > { %v825_v17 = vld [vmem:[%s886_s17 + $0x104] sm:$0xf0]  ;;  %457 = vmatpush.bf16.msra.mxu2 %v779_v7  ;;  %465 = vmatpush.bf16.msra.mxu3 %v703_v8  ;;  %v691_v18 = vor.u32 %v805_v15, %v690_v11  ;;  %v692_v21 = vld [vmem:[%s886_s17 + $0x68] sm:$0xf0]  ;;  %v822_v22 = vld [vmem:[%s886_s17 + $0xf4] sm:$0xf] }
  0x14   : > { %v771_v19 = vor.u32 %v825_v17, %v770_v16  ;;  %437 = vmatpush.bf16.msra.mxu1 %v763_v14  ;;  %v695_v23 = vor.u32 %v804_v20, %v692_v21  ;;  %v764_v24 = vld [vmem:[%s886_s17 + $0xf8] sm:$0xf0]  ;;  %v754_v25 = vld [vmem:[%s886_s17 + $0xe0] sm:$0xf]  ;;  %v821_v26 = vld [vmem:[%s886_s17 + $0xe4] sm:$0xf0] }
  0x15   : > { %v767_v27 = vor.u32 %v822_v22, %v764_v24  ;;  %v755_v28 = vor.u32 %v821_v26, %v754_v25  ;;  %v682_v29 = vld [vmem:[%s886_s17 + $0x50] sm:$0xf]  ;;  %v803_v30 = vld [vmem:[%s886_s17 + $0x54] sm:$0xf0]  ;;  %v802_v31 = vld [vmem:[%s886_s17 + $0x54] sm:$0xf] }
  0x16   : > { %424 = vmatpush.bf16.msra.mxu0 %v691_v18  ;;  %v683_v32 = vor.u32 %v803_v30, %v682_v29  ;;  %v684_v33 = vld [vmem:[%s886_s17 + $0x58] sm:$0xf0]  ;;  %v820_v34 = vld [vmem:[%s886_s17 + $0xe4] sm:$0xf]  ;;  %v756_v35 = vld [vmem:[%s886_s17 + $0xe8] sm:$0xf0] }
  0x17   : > { %458 = vmatpush.bf16.msra.mxu2 %v771_v19  ;;  %466 = vmatpush.bf16.msra.mxu3 %v695_v23  ;;  %v687_v37 = vor.u32 %v802_v31, %v684_v33  ;;  %v746_v38 = vld [vmem:[%s886_s17 + $0xd0] sm:$0xf]  ;;  %v819_v39 = vld [vmem:[%s886_s17 + $0xd4] sm:$0xf0]  ;;  %v674_v40 = vld [vmem:[%s886_s17 + $0x40] sm:$0xf]  ;;  %v759_v41 = vor.u32 %v820_v34, %v756_v35 }
  0x18   : > { %438 = vmatpush.bf16.msra.mxu1 %v755_v28  ;;  %v747_v42 = vor.u32 %v819_v39, %v746_v38  ;;  %v801_v43 = vld [vmem:[%s886_s17 + $0x44] sm:$0xf0]  ;;  %v800_v44 = vld [vmem:[%s886_s17 + $0x44] sm:$0xf]  ;;  %v676_v45 = vld [vmem:[%s886_s17 + $0x48] sm:$0xf0] }
  0x19   : > { %v818_v46 = vld [vmem:[%s886_s17 + $0xd4] sm:$0xf]  ;;  %v748_v47 = vld [vmem:[%s886_s17 + $0xd8] sm:$0xf0]  ;;  %v738_v48 = vld [vmem:[%s886_s17 + $0xc0] sm:$0xf]  ;;  %v675_v49 = vor.u32 %v801_v43, %v674_v40  ;;  %v679_v51 = vor.u32 %v800_v44, %v676_v45 }
  0x1a   : > { %425 = vmatpush.bf16.msra.mxu0 %v683_v32  ;;  %v817_v50 = vld [vmem:[%s886_s17 + $0xc4] sm:$0xf0]  ;;  %784 = vmatmul.msk.bf16.vlgmr.msra.gmra.mxu2 %vm419_vm0, %v918_v36  ;;  %v666_v52 = vld [vmem:[%s886_s17 + $0x30] sm:$0xf]  ;;  %v799_v53 = vld [vmem:[%s886_s17 + $0x34] sm:$0xf0]  ;;  %v751_v54 = vor.u32 %v818_v46, %v748_v47 }
  0x1b   : > { %479 = vmatpush.bf16.msrb.mxu2 %v767_v27  ;;  %467 = vmatpush.bf16.msra.mxu3 %v687_v37  ;;  %v739_v55 = vor.u32 %v817_v50, %v738_v48  ;;  %v798_v56 = vld [vmem:[%s886_s17 + $0x34] sm:$0xf]  ;;  %v668_v57 = vld [vmem:[%s886_s17 + $0x38] sm:$0xf0]  ;;  %v816_v58 = vld [vmem:[%s886_s17 + $0xc4] sm:$0xf]  ;;  %v667_v62 = vor.u32 %v799_v53, %v666_v52 }
  0x1c   : > { %439 = vmatpush.bf16.msra.mxu1 %v747_v42  ;;  %v740_v59 = vld [vmem:[%s886_s17 + $0xc8] sm:$0xf0]  ;;  %v730_v60 = vld [vmem:[%s886_s17 + $0xb0] sm:$0xf]  ;;  %v815_v61 = vld [vmem:[%s886_s17 + $0xb4] sm:$0xf0]  ;;  %v671_v63 = vor.u32 %v798_v56, %v668_v57 }
  0x1d   : > { %v658_v0 = vld [vmem:[%s886_s17 + $0x20] sm:$0xf]  ;;  %v797_v1 = vld [vmem:[%s886_s17 + $0x24] sm:$0xf0]  ;;  %v743_v2 = vor.u32 %v816_v58, %v740_v59  ;;  %v731_v3 = vor.u32 %v815_v61, %v730_v60  ;;  %v796_v4 = vld [vmem:[%s886_s17 + $0x24] sm:$0xf] }
  0x1e   : > { %426 = vmatpush.bf16.msra.mxu0 %v675_v49  ;;  %v660_v5 = vld [vmem:[%s886_s17 + $0x28] sm:$0xf0]  ;;  %v814_v6 = vld [vmem:[%s886_s17 + $0xb4] sm:$0xf]  ;;  %v732_v7 = vld [vmem:[%s886_s17 + $0xb8] sm:$0xf0]  ;;  %v659_v10 = vor.u32 %v797_v1, %v658_v0 }
  0x1f   : > { %480 = vmatpush.bf16.msrb.mxu2 %v759_v41  ;;  %468 = vmatpush.bf16.msra.mxu3 %v679_v51  ;;  %v722_v8 = vld [vmem:[%s886_s17 + $0xa0] sm:$0xf]  ;;  %v813_v9 = vld [vmem:[%s886_s17 + $0xa4] sm:$0xf0]  ;;  %v663_v11 = vor.u32 %v796_v4, %v660_v5  ;;  %v650_v12 = vld [vmem:[%s886_s17 + $0x10] sm:$0xf]  ;;  %v735_v14 = vor.u32 %v814_v6, %v732_v7 }
  0x20   : > { %440 = vmatpush.bf16.msra.mxu1 %v739_v55  ;;  %v795_v13 = vld [vmem:[%s886_s17 + $0x14] sm:$0xf0]  ;;  %v723_v15 = vor.u32 %v813_v9, %v722_v8  ;;  %v794_v16 = vld [vmem:[%s886_s17 + $0x14] sm:$0xf]  ;;  %v652_v17 = vld [vmem:[%s886_s17 + $0x18] sm:$0xf0] }
  0x21   : > { %v812_v18 = vld [vmem:[%s886_s17 + $0xa4] sm:$0xf]  ;;  %v724_v19 = vld [vmem:[%s886_s17 + $0xa8] sm:$0xf0]  ;;  %v714_v20 = vld [vmem:[%s886_s17 + $0x90] sm:$0xf]  ;;  %v651_v22 = vor.u32 %v795_v13, %v650_v12  ;;  %v655_v25 = vor.u32 %v794_v16, %v652_v17 }
  0x22   : > { %427 = vmatpush.bf16.msra.mxu0 %v667_v62  ;;  %v811_v21 = vld [vmem:[%s886_s17 + $0x94] sm:$0xf0]  ;;  %v642_v23 = vld [vmem:[%s886_s17] sm:$0xf]  ;;  %v793_v24 = vld [vmem:[%s886_s17 + $0x4] sm:$0xf0]  ;;  %v727_v29 = vor.u32 %v812_v18, %v724_v19 }
  0x23   : > { %481 = vmatpush.bf16.msrb.mxu2 %v751_v54  ;;  %469 = vmatpush.bf16.msra.mxu3 %v671_v63  ;;  %v792_v26 = vld [vmem:[%s886_s17 + $0x4] sm:$0xf]  ;;  %v644_v27 = vld [vmem:[%s886_s17 + $0x8] sm:$0xf0]  ;;  %v810_v28 = vld [vmem:[%s886_s17 + $0x94] sm:$0xf]  ;;  %v715_v30 = vor.u32 %v811_v21, %v714_v20  ;;  %v643_v39 = vor.u32 %v793_v24, %v642_v23 }
  0x24   : > { %441 = vmatpush.bf16.msra.mxu1 %v731_v3  ;;  %v826_v31 = vld [vmem:[%s886_s17 + $0x114] sm:$0xf]  ;;  %v780_v32 = vld [vmem:[%s886_s17 + $0x118] sm:$0xf0]  ;;  %v212_v33 = vld [vmem:[%s999_s2] sm:$0xff]  ;;  %v851_v38 = vmov 0   ;;  %v647_v42 = vor.u32 %v792_v26, %v644_v27 }
  0x25   : > { %v716_v34 = vld [vmem:[%s886_s17 + $0x98] sm:$0xf0]  ;;  %v706_v35 = vld [vmem:[%s886_s17 + $0x80] sm:$0xf]  ;;  %v809_v37 = vld [vmem:[%s886_s17 + $0x84] sm:$0xf0]  ;;  %838 = vset.pattern.permute.xlu0 %v851_v38  ;;  %v783_v43 = vor.u32 %v826_v31, %v780_v32 }
  0x26   : > { %428 = vmatpush.bf16.msra.mxu0 %v659_v10  ;;  %v630_v40 = vld [vmem:[%s998_s1] sm:$0xf]  ;;  %v790_v41 = vld [vmem:[%s998_s1 + $0x8] sm:$0xf0]  ;;  %216 = vperm.xlu0 %838, %v212_v33   ;;  %v789_v44 = vld [vmem:[%s998_s1 + $0x4] sm:$0xf]  ;;  %v719_v45 = vor.u32 %v810_v28, %v716_v34  ;;  %v707_v46 = vor.u32 %v809_v37, %v706_v35 }
  0x27   : > { %482 = vmatpush.bf16.msrb.mxu2 %v743_v2  ;;  %470 = vmatpush.bf16.msra.mxu3 %v663_v11  ;;  %v632_v47 = vld [vmem:[%s998_s1 + $0xc] sm:$0xf0]  ;;  %v824_v48 = vld [vmem:[%s886_s17 + $0x104] sm:$0xf]  ;;  %v772_v49 = vld [vmem:[%s886_s17 + $0x108] sm:$0xf0]  ;;  %v631_v50 = vor.u32 %v790_v41, %v630_v40 }
  0x28   : > { %442 = vmatpush.bf16.msra.mxu1 %v723_v15  ;;  %v808_v51 = vld [vmem:[%s886_s17 + $0x84] sm:$0xf]  ;;  %v708_v52 = vld [vmem:[%s886_s17 + $0x88] sm:$0xf0]  ;;  %v635_v53 = vor.u32 %v789_v44, %v632_v47  ;;  %v775_v54 = vor.u32 %v824_v48, %v772_v49 }
  0x29   : > { %v213_v55 = vld [vmem:[%s999_s2 + $0x8] sm:$0xff]  ;;  %v711_v56 = vor.u32 %v808_v51, %v708_v52 }
  0x2a   : > { %429 = vmatpush.bf16.msra.mxu0 %v651_v22 }
  0x2b   : > { %483 = vmatpush.bf16.msrb.mxu2 %v735_v14  ;;  %471 = vmatpush.bf16.msra.mxu3 %v655_v25 }
  0x2c   : > { %443 = vmatpush.bf16.msra.mxu1 %v715_v30 }
  0x2e   : > { %430 = vmatpush.bf16.msra.mxu0 %v643_v39  ;;  %221 = vperm.xlu0 %838, %v213_v55  }
  0x2f   : > { %484 = vmatpush.bf16.msrb.mxu2 %v727_v29  ;;  %472 = vmatpush.bf16.msra.mxu3 %v647_v42 }
  0x30   : > { %444 = vmatpush.bf16.msra.mxu1 %v707_v46 }
  0x31   : > { %431 = vmatmul.bf16.vlgmr.msra.gmra.mxu0 %v631_v50 }
  0x32   : > { %499 = vmatpush.bf16.msrb.mxu0 %v783_v43  ;;  %473 = vmatmul.bf16.vlgmr.msra.gmra.mxu3 %v631_v50 }
  0x33   : > { %485 = vmatpush.bf16.msrb.mxu2 %v719_v45  ;;  %445 = vmatmul.bf16.vlgmr.msra.gmra.mxu1 %v635_v53 }
  0x36   : > { %500 = vmatpush.bf16.msrb.mxu0 %v775_v54 }
  0x37   : > { %486 = vmatpush.bf16.msrb.mxu2 %v711_v56 }
  0x3a   : > { %487 = vmatmul.bf16.vlgmr.msrb.gmra.mxu2 %v635_v53 }
  0x41   : > { %785 = vmatmul.msk.bf16.vlgmr.msrb.gmra.mxu0 %vm419_vm0, %v918_v36 }
  0x98   : > { %v217_v60 = vpop.permute.xlu0 %216 }
  0x9d   : > { %v460_v57 = vpop.f32.mrf.mxu2 }
  0xa0   : > { %v222_v5 = vpop.permute.xlu0 %221 }
  0xa5   : > { %v462_v59 = vpop.f32.mrf.mxu2 }
  0xae   : > { %v432_v58 = vpop.f32.mrf.mxu0 }
  0xaf   : > { %v433_v0 = vadd.f32 %v432_v58, %v217_v60 }
  0xb0   : > { %v446_v61 = vpop.f32.mrf.mxu1 }
  0xb1   : > { %v447_v3 = vadd.f32 %v446_v61, %v433_v0 }
  0xb3   : > { %v461_v9 = vadd.f32 %v460_v57, %v447_v3 }
  0xb5   : > { %v474_v62 = vpop.f32.mrf.mxu3 }
  0xb6   : > { %v434_v63 = vpop.f32.mrf.mxu0  ;;  %v475_v1 = vadd.f32 %v474_v62, %v217_v60 }
  0xb7   : > { %v435_v7 = vadd.f32 %v434_v63, %v222_v5 }
  0xb8   : > { %v448_v10 = vpop.f32.mrf.mxu1 }
  0xb9   : > { %v449_v13 = vadd.f32 %v448_v10, %v435_v7 }
  0xbb   : > { %v463_v17 = vadd.f32 %v462_v59, %v449_v13 }
  0xbd   : > { %v488_v2 = vpop.f32.mrf.mxu2  ;;  %v476_v11 = vpop.f32.mrf.mxu3 }
  0xbe   : > { %v489_v4 = vadd.f32 %v488_v2, %v475_v1  ;;  %v502_v6 = vpop.f32.mrf.mxu0  ;;  %v477_v14 = vadd.f32 %v476_v11, %v222_v5 }
  0xc0   : > { %v503_v8 = vadd.f32 %v502_v6, %v489_v4 }
  0xc2   : > { %v507_v36 = vadd.f32 %v503_v8, %v461_v9 }
  0xc4   : > { %508 = vadd.xlane.f32.xlu1 %v507_v36 }
  0xc5   : > { %v490_v12 = vpop.f32.mrf.mxu2 }
  0xc6   : > { %v491_v15 = vadd.f32 %v490_v12, %v477_v14  ;;  %v504_v16 = vpop.f32.mrf.mxu0 }
  0xc8   : > { %v505_v18 = vadd.f32 %v504_v16, %v491_v15 }
  0xca   : > { %v510_v19 = vadd.f32 %v505_v18, %v463_v17 }
  0xcc   : > { %511 = vadd.xlane.f32.xlu1 %v510_v19 }
 0x137   : > { %v509_v20 = vpop.xlane.xlu1 %508 }
 0x138   : > { %v513_v21 = vmul.f32 0.00390625, %v509_v20 }
 0x13a   : > { %v515_v22 = vsub.f32 %v461_v9, %v513_v21  ;;  %v516_v23 = vsub.f32 %v503_v8, %v513_v21 }
 0x13c   : > { %v519_v24 = vmul.f32 %v515_v22, %v515_v22  ;;  %v520_v25 = vmul.f32 %v516_v23, %v516_v23 }
 0x13e   : > { %v523_v26 = vadd.f32 %v520_v25, %v519_v24 }
 0x13f   : > { %v512_v27 = vpop.xlane.xlu1 %511 }
 0x140   : > { %v514_v28 = vmul.f32 0.00390625, %v512_v27  ;;  %524 = vadd.xlane.f32.xlu2 %v523_v26 }
 0x142   : > { %v517_v29 = vsub.f32 %v463_v17, %v514_v28  ;;  %v518_v30 = vsub.f32 %v505_v18, %v514_v28 }
 0x144   : > { %v521_v31 = vmul.f32 %v517_v29, %v517_v29  ;;  %v522_v32 = vmul.f32 %v518_v30, %v518_v30 }
 0x146   : > { %v526_v33 = vadd.f32 %v522_v32, %v521_v31 }
 0x148   : > { %527 = vadd.xlane.f32.xlu2 %v526_v33 }
 0x1b3   : > { %v525_v34 = vpop.xlane.xlu2 %524 }
 0x1b4   : > { %v529_v35 = vmul.f32 0.00390625, %v525_v34 }
 0x1b6   : > { %v531_v37 = vadd.f32 1e-05, %v529_v35 }
 0x1b8   : > { %839 = vrsqrt.f32 %v531_v37  ;;  %vm539_vm2 = vweird.f32 %v531_v37 }
 0x1bb   : > { %v528_v38 = vpop.xlane.xlu2 %527 }
 0x1bc   : > { %v530_v39 = vmul.f32 0.00390625, %v528_v38 }
 0x1be   : > { %v840_v40 = vpop.eup %839  ;;  %v532_v41 = vadd.f32 1e-05, %v530_v39 }
 0x1bf   : > { %v534_v42 = vmul.f32 %v840_v40, %v531_v37  ;;  %vm540_vm1 = vweird.f32 %v840_v40 }
 0x1c0   : > { %841 = vrsqrt.f32 %v532_v41  ;;  %vm541_vm3 = vmor %vm539_vm2, %vm540_vm1  ;;  %vm549_vm5 = vweird.f32 %v532_v41 }
 0x1c1   : > { %v535_v43 = vmul.f32 %v840_v40, %v534_v42 }
 0x1c3   : > { %v536_v44 = vmul.f32 0.5, %v535_v43 }
 0x1c5   : > { %v537_v45 = vsub.f32 1.5, %v536_v44 }
 0x1c6   : > { %v842_v46 = vpop.eup %841 }
 0x1c7   : > { %v538_v47 = vmul.f32 %v840_v40, %v537_v45  ;;  %v544_v48 = vmul.f32 %v842_v46, %v532_v41  ;;  %vm550_vm4 = vweird.f32 %v842_v46 }
 0x1c8   : > { %vm551_vm6 = vmor %vm549_vm5, %vm550_vm4 }
 0x1c9   : > { %v542_v49 = vsel %vm541_vm3, %v840_v40, %v538_v47  ;;  %v545_v50 = vmul.f32 %v842_v46, %v544_v48 }
 0x1ca   : > { %v553_v51 = vmul.f32 %v542_v49, %v515_v22  ;;  %v554_v52 = vmul.f32 %v542_v49, %v516_v23 }
 0x1cb   : > { %v546_v53 = vmul.f32 0.5, %v545_v50 }
 0x1cc   : > { %v557_v54 = vmax.f32 %v553_v51, 0.0  ;;  %v558_v55 = vmax.f32 %v554_v52, 0.0 }
 0x1cd   : > { %v547_v56 = vsub.f32 1.5, %v546_v53 }
 0x1ce   : > { %561 = vst [vmem:[%s170_s10] sm:$0xff] %v557_v54 }
 0x1cf   : > { %562 = vst [vmem:[%s170_s10 + $0x8] sm:$0xff] %v558_v55  ;;  %v548_v57 = vmul.f32 %v842_v46, %v547_v56 }
 0x1d1   : > { %v552_v58 = vsel %vm551_vm6, %v842_v46, %v548_v57 }
 0x1d2   : > { %v555_v59 = vmul.f32 %v552_v58, %v517_v29  ;;  %v556_v60 = vmul.f32 %v552_v58, %v518_v30 }
 0x1d4   : > { %v559_v61 = vmax.f32 %v555_v59, 0.0  ;;  %v560_v62 = vmax.f32 %v556_v60, 0.0 }
 0x1d6   : > { %563 = vst [vmem:[%s170_s10 + $0x10] sm:$0xff] %v559_v61 }
 0x1d7   : > { %564 = vst [vmem:[%s170_s10 + $0x18] sm:$0xff] %v560_v62 }
 0x1d8 PF: > { %s13_s12 = sadd.s32 1, %s849_s12  }
 0x1d9   : > { %p10_p4 = scmp.ge.s32.totalorder %s13_s12, 4  }
 0x1db   :  { %12 = sbr.rel (!%p10_p4) target bundleno = 1 (0x1), region = 62 }

// kernel: run_mid.4
= control target key start
LH: loop header
LB: loop body
LE: loop exit
PB: predicated region body
PF: predicated region fallthrough
CT: control target
= control target key end

     0   :  { %s633_s12 = smov 0   ;;  %s712_s0 = inlined_call_operand.vmem [shape: bf16[2,144,256], index: 0, kind: input, shape index: {}]   ;;  %s713_s1 = inlined_call_operand.vmem [shape: bf16[16,144], index: 1, kind: input, shape index: {}]   ;;  %s714_s2 = inlined_call_operand.vmem [shape: f32[16,1], index: 2, kind: input, shape index: {}]   ;;  %s715_s3 = inlined_call_operand.vmem [shape: f32[2,16,256], index: 3, kind: output, shape index: {}]  }
   0x1 LB: > { %s476_s13 = sadd.s32 4294967295, %s610_s12   ;;  %p480_p0 = scmp.ge.s32.totalorder %s610_s12, 1  ;;  %s610_s12 = sphi %s633_s12, %s13_s12  }
   0x2   : > { %p137_p1 = scmp.lt.s32.totalorder %s610_s12, 3 }
   0x4   : > { %p138_p2 = pnand %p480_p0, %p137_p1 }
   0x5   : > { %p161_p3 = scmp.lt.s32.totalorder (!%p138_p2), %s476_s13, 1 }
   0x6   : > { %141 = sbr.rel (%p138_p2) target bundleno = 464 (0x1d0), region = 32 }
   0xb   : > { %s717_s13 = smov (!%p161_p3, %s476_s13), 1  ;;  %v569_v18 = vld [vmem:[%s713_s1 + $0x4] sm:$0xf]  ;;  %v488_v19 = vld [vmem:[%s713_s1 + $0x8] sm:$0xf0]  ;;  %vm303_vm0 = vcmask 130048  }
   0xc   : > { %s589_s14 = smul.u32 144, %s717_s13  ;;  %v491_v27 = vor.u32 %v569_v18, %v488_v19  ;;  %v192_v35 = vld [vmem:[%s714_s2] sm:$0xff]  ;;  %v612_v38 = vmov 0   ;;  %v193_v49 = vld [vmem:[%s714_s2 + $0x8] sm:$0xff]  ;;  %s568_s30 = sshll.u32 %s717_s13, 5 }
   0xd   : > { %599 = vset.pattern.permute.xlu0 %v612_v38  ;;  %v486_v59 = vld [vmem:[%s713_s1] sm:$0xf]  ;;  %v570_v60 = vld [vmem:[%s713_s1 + $0x4] sm:$0xf0]  ;;  %s170_s6 = scalar_lea.vmem %s715_s3, %s568_s30 }
   0xe   : > { %s647_s17 = scalar_lea.vmem %s712_s0, %s589_s14  ;;  %196 = vperm.xlu0 %599, %v192_v35   ;;  %v487_v62 = vor.u32 %v570_v60, %v486_v59 }
   0xf   : > { %v550_v0 = vld [vmem:[%s647_s17 + $0x70] sm:$0xf]  ;;  %v586_v1 = vld [vmem:[%s647_s17 + $0x74] sm:$0xf0]  ;;  %v585_v2 = vld [vmem:[%s647_s17 + $0x74] sm:$0xf] }
  0x10   : > { %v551_v3 = vor.u32 %v586_v1, %v550_v0  ;;  %v552_v4 = vld [vmem:[%s647_s17 + $0x78] sm:$0xf0]  ;;  %v542_v5 = vld [vmem:[%s647_s17 + $0x60] sm:$0xf]  ;;  %v584_v6 = vld [vmem:[%s647_s17 + $0x64] sm:$0xf0] }
  0x11   : > { %v555_v7 = vor.u32 %v585_v2, %v552_v4  ;;  %v583_v8 = vld [vmem:[%s647_s17 + $0x64] sm:$0xf]  ;;  %v544_v9 = vld [vmem:[%s647_s17 + $0x68] sm:$0xf0]  ;;  %v543_v10 = vor.u32 %v584_v6, %v542_v5  ;;  %v534_v12 = vld [vmem:[%s647_s17 + $0x50] sm:$0xf] }
  0x12   : > { %307 = vmatpush.bf16.msra.mxu0 %v551_v3  ;;  %v547_v11 = vor.u32 %v583_v8, %v544_v9  ;;  %v582_v13 = vld [vmem:[%s647_s17 + $0x54] sm:$0xf0]  ;;  %v581_v14 = vld [vmem:[%s647_s17 + $0x54] sm:$0xf]  ;;  %v536_v15 = vld [vmem:[%s647_s17 + $0x58] sm:$0xf0] }
  0x13   : > { %335 = vmatpush.bf16.msra.mxu2 %v555_v7  ;;  %v535_v16 = vor.u32 %v582_v13, %v534_v12  ;;  %v526_v17 = vld [vmem:[%s647_s17 + $0x40] sm:$0xf]  ;;  %v539_v20 = vor.u32 %v581_v14, %v536_v15  ;;  %v580_v21 = vld [vmem:[%s647_s17 + $0x44] sm:$0xf0]  ;;  %v587_v22 = vld [vmem:[%s647_s17 + $0x84] sm:$0xf] }
  0x14   : > { %v560_v23 = vld [vmem:[%s647_s17 + $0x88] sm:$0xf0]  ;;  %v579_v24 = vld [vmem:[%s647_s17 + $0x44] sm:$0xf]  ;;  %v558_v28 = vld [vmem:[%s647_s17 + $0x80] sm:$0xf]  ;;  %v527_v29 = vor.u32 %v580_v21, %v526_v17 }
  0x15   : > { %v528_v25 = vld [vmem:[%s647_s17 + $0x48] sm:$0xf0]  ;;  %v563_v26 = vor.u32 %v587_v22, %v560_v23  ;;  %v588_v30 = vld [vmem:[%s647_s17 + $0x84] sm:$0xf0]  ;;  %v518_v32 = vld [vmem:[%s647_s17 + $0x30] sm:$0xf] }
  0x16   : > { %308 = vmatpush.bf16.msra.mxu0 %v543_v10  ;;  %v531_v31 = vor.u32 %v579_v24, %v528_v25  ;;  %v578_v33 = vld [vmem:[%s647_s17 + $0x34] sm:$0xf0]  ;;  %v559_v34 = vor.u32 %v588_v30, %v558_v28  ;;  %v577_v36 = vld [vmem:[%s647_s17 + $0x34] sm:$0xf]  ;;  %v520_v37 = vld [vmem:[%s647_s17 + $0x38] sm:$0xf0]  ;;  %201 = vperm.xlu0 %599, %v193_v49  }
  0x17   : > { %336 = vmatpush.bf16.msra.mxu2 %v547_v11  ;;  %356 = vmatpush.bf16.msra.mxu3 %v563_v26  ;;  %v519_v39 = vor.u32 %v578_v33, %v518_v32  ;;  %v523_v40 = vor.u32 %v577_v36, %v520_v37  ;;  %v510_v41 = vld [vmem:[%s647_s17 + $0x20] sm:$0xf]  ;;  %v576_v42 = vld [vmem:[%s647_s17 + $0x24] sm:$0xf0]  ;;  %v575_v43 = vld [vmem:[%s647_s17 + $0x24] sm:$0xf] }
  0x18   : > { %328 = vmatpush.bf16.msra.mxu1 %v559_v34  ;;  %v512_v44 = vld [vmem:[%s647_s17 + $0x28] sm:$0xf0]  ;;  %v511_v45 = vor.u32 %v576_v42, %v510_v41  ;;  %v502_v47 = vld [vmem:[%s647_s17 + $0x10] sm:$0xf]  ;;  %v574_v48 = vld [vmem:[%s647_s17 + $0x14] sm:$0xf0] }
  0x19   : > { %v515_v46 = vor.u32 %v575_v43, %v512_v44  ;;  %v573_v50 = vld [vmem:[%s647_s17 + $0x14] sm:$0xf]  ;;  %v504_v51 = vld [vmem:[%s647_s17 + $0x18] sm:$0xf0]  ;;  %v503_v52 = vor.u32 %v574_v48, %v502_v47  ;;  %v494_v54 = vld [vmem:[%s647_s17] sm:$0xf] }
  0x1a   : > { %309 = vmatpush.bf16.msra.mxu0 %v535_v16  ;;  %565 = vmatmul.msk.bf16.vlgmr.msra.gmra.mxu3 %vm303_vm0, %v491_v27  ;;  %v507_v53 = vor.u32 %v573_v50, %v504_v51  ;;  %v572_v55 = vld [vmem:[%s647_s17 + $0x4] sm:$0xf0]  ;;  %v571_v56 = vld [vmem:[%s647_s17 + $0x4] sm:$0xf]  ;;  %v496_v57 = vld [vmem:[%s647_s17 + $0x8] sm:$0xf0] }
  0x1b   : > { %337 = vmatpush.bf16.msra.mxu2 %v539_v20  ;;  %564 = vmatmul.msk.bf16.vlgmr.msra.gmra.mxu1 %vm303_vm0, %v491_v27  ;;  %v495_v58 = vor.u32 %v572_v55, %v494_v54  ;;  %v499_v61 = vor.u32 %v571_v56, %v496_v57 }
  0x1e   : > { %310 = vmatpush.bf16.msra.mxu0 %v527_v29 }
  0x1f   : > { %338 = vmatpush.bf16.msra.mxu2 %v531_v31 }
  0x22   : > { %311 = vmatpush.bf16.msra.mxu0 %v519_v39 }
  0x23   : > { %339 = vmatpush.bf16.msra.mxu2 %v523_v40 }
  0x26   : > { %312 = vmatpush.bf16.msra.mxu0 %v511_v45 }
  0x27   : > { %340 = vmatpush.bf16.msra.mxu2 %v515_v46 }
  0x2a   : > { %313 = vmatpush.bf16.msra.mxu0 %v503_v52 }
  0x2b   : > { %341 = vmatpush.bf16.msra.mxu2 %v507_v53 }
  0x2e   : > { %314 = vmatpush.bf16.msra.mxu0 %v495_v58 }
  0x2f   : > { %342 = vmatpush.bf16.msra.mxu2 %v499_v61 }
  0x31   : > { %315 = vmatmul.bf16.vlgmr.msra.gmra.mxu0 %v487_v62 }
  0x32   : > { %343 = vmatmul.bf16.vlgmr.msra.gmra.mxu2 %v487_v62 }
  0x80   : > { %v197_v0 = vpop.permute.xlu0 %196 }
  0x88   : > { %v202_v10 = vpop.permute.xlu0 %201 }
  0x98   : > { %v330_v2 = vpop.f32.mrf.mxu1 }
  0x9d   : > { %v358_v3 = vpop.f32.mrf.mxu3 }
  0xa0   : > { %v332_v14 = vpop.f32.mrf.mxu1 }
  0xa5   : > { %v360_v15 = vpop.f32.mrf.mxu3 }
  0xae   : > { %v316_v63 = vpop.f32.mrf.mxu0 }
  0xaf   : > { %v317_v1 = vadd.f32 %v316_v63, %v197_v0 }
  0xb1   : > { %v331_v5 = vadd.f32 %v330_v2, %v317_v1 }
  0xb5   : > { %v344_v4 = vpop.f32.mrf.mxu2 }
  0xb6   : > { %v345_v6 = vadd.f32 %v344_v4, %v197_v0  ;;  %v318_v8 = vpop.f32.mrf.mxu0 }
  0xb7   : > { %v319_v11 = vadd.f32 %v318_v8, %v202_v10 }
  0xb8   : > { %v359_v7 = vadd.f32 %v358_v3, %v345_v6 }
  0xb9   : > { %v333_v16 = vadd.f32 %v332_v14, %v319_v11 }
  0xba   : > { %v363_v9 = vadd.f32 %v359_v7, %v331_v5 }
  0xbc   : > { %364 = vadd.xlane.f32.xlu1 %v363_v9 }
  0xbd   : > { %v346_v12 = vpop.f32.mrf.mxu2 }
  0xbe   : > { %v347_v13 = vadd.f32 %v346_v12, %v202_v10 }
  0xc0   : > { %v361_v17 = vadd.f32 %v360_v15, %v347_v13 }
  0xc2   : > { %v366_v18 = vadd.f32 %v361_v17, %v333_v16 }
  0xc4   : > { %367 = vadd.xlane.f32.xlu1 %v366_v18 }
 0x12f   : > { %v365_v19 = vpop.xlane.xlu1 %364 }
 0x130   : > { %v369_v20 = vmul.f32 0.00390625, %v365_v19 }
 0x132   : > { %v371_v21 = vsub.f32 %v331_v5, %v369_v20  ;;  %v372_v22 = vsub.f32 %v359_v7, %v369_v20 }
 0x134   : > { %v375_v23 = vmul.f32 %v371_v21, %v371_v21  ;;  %v376_v24 = vmul.f32 %v372_v22, %v372_v22 }
 0x136   : > { %v379_v25 = vadd.f32 %v376_v24, %v375_v23 }
 0x137   : > { %v368_v26 = vpop.xlane.xlu1 %367 }
 0x138   : > { %v370_v27 = vmul.f32 0.00390625, %v368_v26  ;;  %380 = vadd.xlane.f32.xlu2 %v379_v25 }
 0x13a   : > { %v373_v28 = vsub.f32 %v333_v16, %v370_v27  ;;  %v374_v29 = vsub.f32 %v361_v17, %v370_v27 }
 0x13c   : > { %v377_v30 = vmul.f32 %v373_v28, %v373_v28  ;;  %v378_v31 = vmul.f32 %v374_v29, %v374_v29 }
 0x13e   : > { %v382_v32 = vadd.f32 %v378_v31, %v377_v30 }
 0x140   : > { %383 = vadd.xlane.f32.xlu2 %v382_v32 }
 0x1ab   : > { %v381_v33 = vpop.xlane.xlu2 %380 }
 0x1ac   : > { %v385_v34 = vmul.f32 0.00390625, %v381_v33 }
 0x1ae   : > { %v387_v35 = vadd.f32 1e-05, %v385_v34 }
 0x1b0   : > { %600 = vrsqrt.f32 %v387_v35  ;;  %vm395_vm2 = vweird.f32 %v387_v35 }
 0x1b3   : > { %v384_v36 = vpop.xlane.xlu2 %383 }
 0x1b4   : > { %v386_v37 = vmul.f32 0.00390625, %v384_v36 }
 0x1b6   : > { %v601_v38 = vpop.eup %600  ;;  %v388_v39 = vadd.f32 1e-05, %v386_v37 }
 0x1b7   : > { %v390_v40 = vmul.f32 %v601_v38, %v387_v35  ;;  %vm396_vm1 = vweird.f32 %v601_v38 }
 0x1b8   : > { %602 = vrsqrt.f32 %v388_v39  ;;  %vm397_vm3 = vmor %vm395_vm2, %vm396_vm1  ;;  %vm405_vm5 = vweird.f32 %v388_v39 }
 0x1b9   : > { %v391_v41 = vmul.f32 %v601_v38, %v390_v40 }
 0x1bb   : > { %v392_v42 = vmul.f32 0.5, %v391_v41 }
 0x1bd   : > { %v393_v43 = vsub.f32 1.5, %v392_v42 }
 0x1be   : > { %v603_v44 = vpop.eup %602 }
 0x1bf   : > { %v394_v45 = vmul.f32 %v601_v38, %v393_v43  ;;  %v400_v46 = vmul.f32 %v603_v44, %v388_v39  ;;  %vm406_vm4 = vweird.f32 %v603_v44 }
 0x1c0   : > { %vm407_vm6 = vmor %vm405_vm5, %vm406_vm4 }
 0x1c1   : > { %v398_v47 = vsel %vm397_vm3, %v601_v38, %v394_v45  ;;  %v401_v48 = vmul.f32 %v603_v44, %v400_v46 }
 0x1c2   : > { %v409_v49 = vmul.f32 %v398_v47, %v371_v21  ;;  %v410_v50 = vmul.f32 %v398_v47, %v372_v22 }
 0x1c3   : > { %v402_v51 = vmul.f32 0.5, %v401_v48 }
 0x1c4   : > { %v413_v52 = vmax.f32 %v409_v49, 0.0  ;;  %v414_v53 = vmax.f32 %v410_v50, 0.0 }
 0x1c5   : > { %v403_v54 = vsub.f32 1.5, %v402_v51 }
 0x1c6   : > { %417 = vst [vmem:[%s170_s6] sm:$0xff] %v413_v52 }
 0x1c7   : > { %418 = vst [vmem:[%s170_s6 + $0x8] sm:$0xff] %v414_v53  ;;  %v404_v55 = vmul.f32 %v603_v44, %v403_v54 }
 0x1c9   : > { %v408_v56 = vsel %vm407_vm6, %v603_v44, %v404_v55 }
 0x1ca   : > { %v411_v57 = vmul.f32 %v408_v56, %v373_v28  ;;  %v412_v58 = vmul.f32 %v408_v56, %v374_v29 }
 0x1cc   : > { %v415_v59 = vmax.f32 %v411_v57, 0.0  ;;  %v416_v60 = vmax.f32 %v412_v58, 0.0 }
 0x1ce   : > { %419 = vst [vmem:[%s170_s6 + $0x10] sm:$0xff] %v415_v59 }
 0x1cf   : > { %420 = vst [vmem:[%s170_s6 + $0x18] sm:$0xff] %v416_v60 }
 0x1d0 PF: > { %s13_s12 = sadd.s32 1, %s610_s12  }
 0x1d1   : > { %p10_p4 = scmp.ge.s32.totalorder %s13_s12, 4  }
 0x1d3   :  { %12 = sbr.rel (!%p10_p4) target bundleno = 1 (0x1), region = 62 }

// kernel: run_mid.5
= control target key start
LH: loop header
LB: loop body
LE: loop exit
PB: predicated region body
PF: predicated region fallthrough
CT: control target
= control target key end

     0   :  { %s576_s12 = smov 0   ;;  %s647_s0 = inlined_call_operand.vmem [shape: bf16[2,144,256], index: 0, kind: input, shape index: {}]   ;;  %s648_s1 = inlined_call_operand.vmem [shape: bf16[8,144], index: 1, kind: input, shape index: {}]   ;;  %s649_s2 = inlined_call_operand.vmem [shape: f32[8,1], index: 2, kind: input, shape index: {}]   ;;  %s650_s3 = inlined_call_operand.vmem [shape: f32[2,8,256], index: 3, kind: output, shape index: {}]  }
   0x1 LB: > { %s431_s13 = sadd.s32 4294967295, %s553_s12   ;;  %p435_p0 = scmp.ge.s32.totalorder %s553_s12, 1  ;;  %s553_s12 = sphi %s576_s12, %s13_s12  }
   0x2   : > { %p137_p1 = scmp.lt.s32.totalorder %s553_s12, 3 }
   0x4   : > { %p138_p2 = pnand %p435_p0, %p137_p1 }
   0x5   : > { %p161_p3 = scmp.lt.s32.totalorder (!%p138_p2), %s431_s13, 1 }
   0x6   : > { %141 = sbr.rel (%p138_p2) target bundleno = 454 (0x1c6), region = 32 }
   0xb   : > { %s652_s13 = smov (!%p161_p3, %s431_s13), 1  ;;  %v603_v11 = vld [vmem:[%s648_s1] sm:$0xff]  ;;  %vm293_vm0 = vcmask 130048   ;;  %v555_v38 = vmov 0  }
   0xc   : > { %s534_s14 = smul.u32 144, %s652_s13  ;;  %v199_v17 = vunpack.c.h.b16 %v603_v11  ;;  %v191_v35 = vld [vmem:[%s649_s2] sm:$0xff]  ;;  %544 = vset.pattern.permute.xlu0 %v555_v38  ;;  %v198_v57 = vunpack.c.l.b16 %v603_v11  ;;  %s515_s22 = sshll.u32 %s652_s13, 4 }
   0xd   : > { %194 = vperm.xlu0 %544, %v191_v35   ;;  %s170_s25 = scalar_lea.vmem %s650_s3, %s515_s22 }
   0xe   : > { %s590_s17 = scalar_lea.vmem %s647_s0, %s534_s14  ;;  %v201_v27 = vpack.c.b16 %v199_v17, %v199_v17  ;;  %v200_v60 = vpack.c.b16 %v198_v57, %v198_v57 }
   0xf   : > { %v497_v0 = vld [vmem:[%s590_s17 + $0x70] sm:$0xf]  ;;  %v531_v1 = vld [vmem:[%s590_s17 + $0x74] sm:$0xf0]  ;;  %v530_v2 = vld [vmem:[%s590_s17 + $0x74] sm:$0xf] }
  0x10   : > { %v498_v3 = vor.u32 %v531_v1, %v497_v0  ;;  %v499_v4 = vld [vmem:[%s590_s17 + $0x78] sm:$0xf0]  ;;  %v489_v5 = vld [vmem:[%s590_s17 + $0x60] sm:$0xf]  ;;  %v529_v6 = vld [vmem:[%s590_s17 + $0x64] sm:$0xf0] }
  0x11   : > { %v502_v7 = vor.u32 %v530_v2, %v499_v4  ;;  %v528_v8 = vld [vmem:[%s590_s17 + $0x64] sm:$0xf]  ;;  %v491_v9 = vld [vmem:[%s590_s17 + $0x68] sm:$0xf0]  ;;  %v490_v10 = vor.u32 %v529_v6, %v489_v5  ;;  %v481_v13 = vld [vmem:[%s590_s17 + $0x50] sm:$0xf] }
  0x12   : > { %297 = vmatpush.bf16.msra.mxu0 %v498_v3  ;;  %v494_v12 = vor.u32 %v528_v8, %v491_v9  ;;  %v527_v14 = vld [vmem:[%s590_s17 + $0x54] sm:$0xf0]  ;;  %v526_v15 = vld [vmem:[%s590_s17 + $0x54] sm:$0xf]  ;;  %v483_v16 = vld [vmem:[%s590_s17 + $0x58] sm:$0xf0] }
  0x13   : > { %323 = vmatpush.bf16.msra.mxu2 %v502_v7  ;;  %v482_v18 = vor.u32 %v527_v14, %v481_v13  ;;  %v473_v19 = vld [vmem:[%s590_s17 + $0x40] sm:$0xf]  ;;  %v486_v20 = vor.u32 %v526_v15, %v483_v16  ;;  %v525_v21 = vld [vmem:[%s590_s17 + $0x44] sm:$0xf0]  ;;  %v532_v22 = vld [vmem:[%s590_s17 + $0x84] sm:$0xf] }
  0x14   : > { %v507_v23 = vld [vmem:[%s590_s17 + $0x88] sm:$0xf0]  ;;  %v524_v24 = vld [vmem:[%s590_s17 + $0x44] sm:$0xf]  ;;  %v505_v28 = vld [vmem:[%s590_s17 + $0x80] sm:$0xf]  ;;  %v474_v29 = vor.u32 %v525_v21, %v473_v19 }
  0x15   : > { %v475_v25 = vld [vmem:[%s590_s17 + $0x48] sm:$0xf0]  ;;  %v510_v26 = vor.u32 %v532_v22, %v507_v23  ;;  %v533_v30 = vld [vmem:[%s590_s17 + $0x84] sm:$0xf0]  ;;  %v465_v32 = vld [vmem:[%s590_s17 + $0x30] sm:$0xf] }
  0x16   : > { %298 = vmatpush.bf16.msra.mxu0 %v490_v10  ;;  %v478_v31 = vor.u32 %v524_v24, %v475_v25  ;;  %v523_v33 = vld [vmem:[%s590_s17 + $0x34] sm:$0xf0]  ;;  %v506_v34 = vor.u32 %v533_v30, %v505_v28  ;;  %v522_v36 = vld [vmem:[%s590_s17 + $0x34] sm:$0xf]  ;;  %v467_v37 = vld [vmem:[%s590_s17 + $0x38] sm:$0xf0] }
  0x17   : > { %324 = vmatpush.bf16.msra.mxu2 %v494_v12  ;;  %343 = vmatpush.bf16.msra.mxu3 %v510_v26  ;;  %v466_v39 = vor.u32 %v523_v33, %v465_v32  ;;  %v470_v40 = vor.u32 %v522_v36, %v467_v37  ;;  %v457_v41 = vld [vmem:[%s590_s17 + $0x20] sm:$0xf]  ;;  %v521_v42 = vld [vmem:[%s590_s17 + $0x24] sm:$0xf0]  ;;  %v520_v43 = vld [vmem:[%s590_s17 + $0x24] sm:$0xf] }
  0x18   : > { %317 = vmatpush.bf16.msra.mxu1 %v506_v34  ;;  %v459_v44 = vld [vmem:[%s590_s17 + $0x28] sm:$0xf0]  ;;  %v458_v45 = vor.u32 %v521_v42, %v457_v41  ;;  %v449_v47 = vld [vmem:[%s590_s17 + $0x10] sm:$0xf]  ;;  %v519_v48 = vld [vmem:[%s590_s17 + $0x14] sm:$0xf0] }
  0x19   : > { %v462_v46 = vor.u32 %v520_v43, %v459_v44  ;;  %v518_v49 = vld [vmem:[%s590_s17 + $0x14] sm:$0xf]  ;;  %v451_v50 = vld [vmem:[%s590_s17 + $0x18] sm:$0xf0]  ;;  %v450_v51 = vor.u32 %v519_v48, %v449_v47  ;;  %v441_v53 = vld [vmem:[%s590_s17] sm:$0xf] }
  0x1a   : > { %299 = vmatpush.bf16.msra.mxu0 %v482_v18  ;;  %512 = vmatmul.msk.bf16.vlgmr.msra.gmra.mxu3 %vm293_vm0, %v201_v27  ;;  %v454_v52 = vor.u32 %v518_v49, %v451_v50  ;;  %v517_v54 = vld [vmem:[%s590_s17 + $0x4] sm:$0xf0]  ;;  %v516_v55 = vld [vmem:[%s590_s17 + $0x4] sm:$0xf]  ;;  %v443_v56 = vld [vmem:[%s590_s17 + $0x8] sm:$0xf0] }
  0x1b   : > { %325 = vmatpush.bf16.msra.mxu2 %v486_v20  ;;  %511 = vmatmul.msk.bf16.vlgmr.msra.gmra.mxu1 %vm293_vm0, %v201_v27  ;;  %v442_v58 = vor.u32 %v517_v54, %v441_v53  ;;  %v446_v59 = vor.u32 %v516_v55, %v443_v56 }
  0x1e   : > { %300 = vmatpush.bf16.msra.mxu0 %v474_v29 }
  0x1f   : > { %326 = vmatpush.bf16.msra.mxu2 %v478_v31 }
  0x22   : > { %301 = vmatpush.bf16.msra.mxu0 %v466_v39 }
  0x23   : > { %327 = vmatpush.bf16.msra.mxu2 %v470_v40 }
  0x26   : > { %302 = vmatpush.bf16.msra.mxu0 %v458_v45 }
  0x27   : > { %328 = vmatpush.bf16.msra.mxu2 %v462_v46 }
  0x2a   : > { %303 = vmatpush.bf16.msra.mxu0 %v450_v51 }
  0x2b   : > { %329 = vmatpush.bf16.msra.mxu2 %v454_v52 }
  0x2e   : > { %304 = vmatpush.bf16.msra.mxu0 %v442_v58 }
  0x2f   : > { %330 = vmatpush.bf16.msra.mxu2 %v446_v59 }
  0x31   : > { %305 = vmatmul.bf16.vlgmr.msra.gmra.mxu0 %v200_v60 }
  0x32   : > { %331 = vmatmul.bf16.vlgmr.msra.gmra.mxu2 %v200_v60 }
  0x7f   : > { %v195_v2 = vpop.permute.xlu0 %194 }
  0x98   : > { %v319_v61 = vpop.f32.mrf.mxu1 }
  0x9d   : > { %v345_v62 = vpop.f32.mrf.mxu3 }
  0xa0   : > { %v321_v63 = vpop.f32.mrf.mxu1 }
  0xa5   : > { %v347_v0 = vpop.f32.mrf.mxu3 }
  0xae   : > { %v306_v1 = vpop.f32.mrf.mxu0 }
  0xaf   : > { %v307_v3 = vadd.f32 %v306_v1, %v195_v2 }
  0xb1   : > { %v320_v7 = vadd.f32 %v319_v61, %v307_v3 }
  0xb5   : > { %v332_v4 = vpop.f32.mrf.mxu2 }
  0xb6   : > { %v333_v5 = vadd.f32 %v332_v4, %v195_v2  ;;  %v308_v6 = vpop.f32.mrf.mxu0 }
  0xb8   : > { %v346_v8 = vadd.f32 %v345_v62, %v333_v5 }
  0xba   : > { %v349_v9 = vadd.f32 %v346_v8, %v320_v7 }
  0xbc   : > { %350 = vadd.xlane.f32.xlu0 %v349_v9 }
  0xbd   : > { %v334_v10 = vpop.f32.mrf.mxu2 }
 0x12f   : > { %v351_v11 = vpop.xlane.xlu0 %350 }
 0x130   : > { %v352_v12 = vmul.f32 0.00390625, %v351_v11 }
 0x132   : > { %v353_v13 = vsub.f32 %v320_v7, %v352_v12  ;;  %v354_v14 = vsub.f32 %v346_v8, %v352_v12 }
 0x134   : > { %v355_v15 = vmul.f32 %v353_v13, %v353_v13  ;;  %v356_v16 = vmul.f32 %v354_v14, %v354_v14 }
 0x136   : > { %v357_v17 = vadd.f32 %v356_v16, %v355_v15 }
 0x138   : > { %358 = vadd.xlane.f32.xlu1 %v357_v17 }
 0x1ab   : > { %v359_v18 = vpop.xlane.xlu1 %358 }
 0x1ac   : > { %v360_v19 = vmul.f32 0.00390625, %v359_v18 }
 0x1ae   : > { %v361_v20 = vadd.f32 1e-05, %v360_v19 }
 0x1b0   : > { %545 = vrsqrt.f32 %v361_v20  ;;  %vm368_vm2 = vweird.f32 %v361_v20 }
 0x1b6   : > { %v546_v21 = vpop.eup %545 }
 0x1b7   : > { %v363_v22 = vmul.f32 %v546_v21, %v361_v20  ;;  %vm369_vm1 = vweird.f32 %v546_v21 }
 0x1b8   : > { %vm370_vm3 = vmor %vm368_vm2, %vm369_vm1 }
 0x1b9   : > { %v364_v23 = vmul.f32 %v546_v21, %v363_v22 }
 0x1bb   : > { %v365_v24 = vmul.f32 0.5, %v364_v23 }
 0x1bd   : > { %v366_v25 = vsub.f32 1.5, %v365_v24 }
 0x1bf   : > { %v367_v26 = vmul.f32 %v546_v21, %v366_v25 }
 0x1c1   : > { %v371_v27 = vsel %vm370_vm3, %v546_v21, %v367_v26 }
 0x1c2   : > { %v372_v28 = vmul.f32 %v371_v27, %v353_v13  ;;  %v373_v29 = vmul.f32 %v371_v27, %v354_v14 }
 0x1c4   : > { %374 = vst [vmem:[%s170_s25] sm:$0xff] %v372_v28 }
 0x1c5   : > { %375 = vst [vmem:[%s170_s25 + $0x8] sm:$0xff] %v373_v29 }
 0x1c6 PF: > { %s13_s12 = sadd.s32 1, %s553_s12  }
 0x1c7   : > { %p10_p4 = scmp.ge.s32.totalorder %s13_s12, 4  }
 0x1c9   :  { %12 = sbr.rel (!%p10_p4) target bundleno = 1 (0x1), region = 62 }

</bundles_post_ra>
